<compile_context>
chip_gen: v5e
topology: v5e:2x2
jax: 0.10.0
libtpu: 0.0.40
codegen_flags: <defaults>
</compile_context>

<pallas_src>
import functools

import jax
import jax.numpy as jnp
from jax.experimental import pallas as pl
from jax.experimental.pallas import tpu as pltpu

_LN_EPS = 1e-5  # torch.nn.LayerNorm default


def _round_up(x, m):
    return ((x + m - 1) // m) * m


def _vmem_limit_bytes():
    # Generation-aware VMEM budget: ~75% of physical capacity leaves headroom for
    # Mosaic internal scratch and the pipeline double buffers (v7x: 64 MiB physical).
    try:
        cap = int(pltpu.get_tpu_info().vmem_capacity_bytes)
    except Exception:
        cap = 64 * 1024 * 1024
    return max(32 * 1024 * 1024, cap * 3 // 4)


# ----------------------------- Pallas kernel -----------------------------

def _proj_ln_kernel(x_ref, w_ref, b_ref, g_ref, beta_ref, o_ref):
    # x: (TM, Kp) bf16   w: (Kp, C) bf16   b/g/beta: (1, C) f32   o: (TM, C) bf16
    # Fused:  y = x @ w + b ;  o = LayerNorm(y) * g + beta   (stats / affine in f32)
    acc = jnp.dot(x_ref[...], w_ref[...], preferred_element_type=jnp.float32)
    y = acc + b_ref[...]
    # Block C equals the full embed_dim (no lane padding of C), so the mean over
    # axis=-1 uses exactly the true channel count.
    u = jnp.mean(y, axis=-1, keepdims=True)
    yc = y - u
    var = jnp.mean(yc * yc, axis=-1, keepdims=True)
    out = yc * jax.lax.rsqrt(var + _LN_EPS) * g_ref[...] + beta_ref[...]
    o_ref[...] = out.astype(o_ref.dtype)


def pallas_proj_layernorm(patches2d, w, b, ln_w, ln_b, *, tm=1024,
                          out_dtype=jnp.bfloat16):
    """Fused (M, Kp) @ (Kp, C) matmul + bias + LayerNorm over C, tiled over M."""
    M, Kp = patches2d.shape
    C = w.shape[1]

    # Row tile: multiple of 16 (bf16 sublane packing), capped so the grid has at least
    # 2 steps when M allows (v7x megacore sharding). No padding of M: grid uses cdiv
    # and Pallas masks the final partial block's stores.
    TM = max(16, min(tm, _round_up(-(-M // 2), 16)))
    grid = (pl.cdiv(M, TM),)

    out = pl.pallas_call(
        _proj_ln_kernel,
        out_shape=jax.ShapeDtypeStruct((M, C), out_dtype),
        grid=grid,
        in_specs=[
            pl.BlockSpec((TM, Kp), lambda i: (i, 0)),  # activations: streamed per tile
            pl.BlockSpec((Kp, C), lambda i: (0, 0)),   # weight: VMEM-resident (bf16)
            pl.BlockSpec((1, C), lambda i: (0, 0)),    # conv bias   (f32)
            pl.BlockSpec((1, C), lambda i: (0, 0)),    # LN gamma    (f32)
            pl.BlockSpec((1, C), lambda i: (0, 0)),    # LN beta     (f32)
        ],
        out_specs=pl.BlockSpec((TM, C), lambda i: (i, 0)),
        compiler_params=pltpu.CompilerParams(
            dimension_semantics=("parallel",),
            vmem_limit_bytes=_vmem_limit_bytes()),
    )(patches2d, w, b.reshape(1, C), ln_w.reshape(1, C), ln_b.reshape(1, C))
    return out


# ----------------------------- forward -----------------------------

@functools.partial(jax.jit, static_argnames=("patch_size", "stride"))
def overlap_patch_embed_forward(params, x_nchw, *, patch_size=7, stride=4):
    """Matches OverlapPatchEmbed.forward: returns (tokens (B, H*W, C), H, W)."""
    N, Cin, H, W = x_nchw.shape
    pad = patch_size // 2
    Ho = (H + 2 * pad - patch_size) // stride + 1
    Wo = (W + 2 * pad - patch_size) // stride + 1

    # Cast to bf16 BEFORE the gather so the im2col slab (the largest intermediate) is
    # built, written and re-read in bf16 rather than f32 + a separate cast pass.
    x = jnp.transpose(x_nchw, (0, 2, 3, 1)).astype(jnp.bfloat16)   # NCHW -> NHWC (bf16)
    xp = jnp.pad(x, ((0, 0), (pad, pad), (pad, pad), (0, 0)))

    # TODO(synk): overlapping-patch gather (im2col) kept as plain-JAX glue; an
    # in-kernel halo-tiled gather would remove this slab from HBM entirely.
    K = patch_size * patch_size * Cin
    Kp = _round_up(K, 128)   # zero-pad contraction dim: unmasked loads, clean MXU tiles
    cols = []
    for kh in range(patch_size):
        for kw in range(patch_size):
            cols.append(xp[:,
                           kh:kh + stride * (Ho - 1) + 1:stride,
                           kw:kw + stride * (Wo - 1) + 1:stride, :])
    if Kp != K:
        cols.append(jnp.zeros((N, Ho, Wo, Kp - K), jnp.bfloat16))
    patches = jnp.concatenate(cols, axis=-1)                       # (N, Ho, Wo, Kp)
    patches2d = patches.reshape(N * Ho * Wo, Kp)

    # Zero-pad the (tiny) weight rows to Kp; the padded activation columns are zero so
    # the math is exact.
    w = params['proj_w']
    if Kp != w.shape[0]:
        w = jnp.pad(w, ((0, Kp - w.shape[0]), (0, 0)))
    C = w.shape[1]

    y = pallas_proj_layernorm(patches2d, w,
                              params['proj_b'],                    # (C,)  f32
                              params['ln_w'], params['ln_b'])      # (C,)  f32
    return y.reshape(N, Ho * Wo, C), Ho, Wo


# ----------------------------- parameter init -----------------------------

def init_params(key, in_chans=3, embed_dim=256, patch_size=7):
    # Mirrors the PyTorch _init_weights: Conv2d ~ N(0, sqrt(2/fan_out)), bias 0,
    # LayerNorm weight 1 / bias 0.
    fan_out = patch_size * patch_size * embed_dim
    std = (2.0 / fan_out) ** 0.5
    # NOTE: a PyTorch checkpoint stores conv weight as (Cout, Cin, kh, kw); it must be
    # permuted to (kh, kw, Cin, Cout) and flattened to (kh*kw*Cin, Cout) to match the
    # im2col column order (kh-major, then kw, then Cin) used above.
    w = std * jax.random.normal(key, (patch_size * patch_size * in_chans, embed_dim),
                                jnp.float32)
    return {
        'proj_w': w.astype(jnp.bfloat16),   # bf16 MXU operand; f32 accumulation in-kernel
        'proj_b': jnp.zeros((embed_dim,), jnp.float32),
        'ln_w': jnp.ones((embed_dim,), jnp.float32),
        'ln_b': jnp.zeros((embed_dim,), jnp.float32),
    }


# ----------------------------- main -----------------------------

if __name__ == "__main__":
    key = jax.random.PRNGKey(0)
    k_param, k_x = jax.random.split(key)

    in_chans, embed_dim, patch, stride = 3, 256, 7, 4   # lane-dense C (multiple of 128)
    params = init_params(k_param, in_chans, embed_dim, patch)

    # Input like the PyTorch module: NCHW, small spatial size.
    x = jax.random.normal(k_x, (2, in_chans, 16, 16), jnp.float32)

    tokens, H, W = overlap_patch_embed_forward(params, x, patch_size=patch, stride=stride)
    tokens = jax.block_until_ready(tokens)

    Hs, Ws = int(H), int(W)
    assert (Hs, Ws) == (4, 4), (Hs, Ws)
    assert tokens.shape == (2, Hs * Ws, embed_dim), tokens.shape
    assert tokens.dtype == jnp.bfloat16, tokens.dtype
    assert bool(jnp.all(jnp.isfinite(tokens.astype(jnp.float32))))
    print("KERNEL_OK")
</pallas_src>

<mosaic_0001>
module attributes {stable_mosaic.version = 11 : i64} {
  func.func @_proj_ln_kernel(%arg0: i32, %arg1: memref<16x256xbf16, #tpu.memory_space<vmem>>, %arg2: memref<256x256xbf16, #tpu.memory_space<vmem>>, %arg3: memref<1x256xf32, #tpu.memory_space<vmem>>, %arg4: memref<1x256xf32, #tpu.memory_space<vmem>>, %arg5: memref<1x256xf32, #tpu.memory_space<vmem>>, %arg6: memref<16x256xbf16, #tpu.memory_space<vmem>>) attributes {dimension_semantics = [#tpu.dimension_semantics<parallel>], iteration_bounds = array<i64: 2>, scalar_prefetch = 0 : i64, scratch_operands = 0 : i64, tpu.core_type = #tpu.core_type<tc>, window_params = [{transform_indices = @transform_0, window_bounds = array<i64: 16, 256>}, {pipeline_mode = #tpu.pipeline_mode<synchronous>, transform_indices = @transform_1, window_bounds = array<i64: 256, 256>}, {pipeline_mode = #tpu.pipeline_mode<synchronous>, transform_indices = @transform_2, window_bounds = array<i64: 1, 256>}, {pipeline_mode = #tpu.pipeline_mode<synchronous>, transform_indices = @transform_3, window_bounds = array<i64: 1, 256>}, {pipeline_mode = #tpu.pipeline_mode<synchronous>, transform_indices = @transform_4, window_bounds = array<i64: 1, 256>}, {transform_indices = @transform_5, window_bounds = array<i64: 16, 256>}]} {
    %c0 = arith.constant 0 : index
    %c0_0 = arith.constant 0 : index
    %0 = vector.load %arg1[%c0, %c0_0] : memref<16x256xbf16, #tpu.memory_space<vmem>>, vector<16x256xbf16>
    %c0_1 = arith.constant 0 : index
    %c0_2 = arith.constant 0 : index
    %1 = vector.load %arg2[%c0_1, %c0_2] : memref<256x256xbf16, #tpu.memory_space<vmem>>, vector<256x256xbf16>
    %cst = arith.constant dense<0.000000e+00> : vector<16x256xf32>
    %2 = tpu.matmul %0, %1, %cst {dimension_numbers = #tpu.dot_dimension_numbers<[1], [0], [0], [1], [0, 0, 1, 1], [], []>} : vector<16x256xbf16>, vector<256x256xbf16>, vector<16x256xf32> -> vector<16x256xf32>
    %c0_3 = arith.constant 0 : index
    %c0_4 = arith.constant 0 : index
    %3 = vector.load %arg3[%c0_3, %c0_4] : memref<1x256xf32, #tpu.memory_space<vmem>>, vector<1x256xf32>
    %4 = vector.broadcast %3 : vector<1x256xf32> to vector<16x256xf32>
    %5 = arith.addf %2, %4 : vector<16x256xf32>
    %cst_5 = arith.constant dense<0.000000e+00> : vector<16xf32>
    %6 = vector.multi_reduction <add>, %5, %cst_5 [1] : vector<16x256xf32> to vector<16xf32>
    %7 = vector.shape_cast %6 : vector<16xf32> to vector<16x1xf32>
    %cst_6 = arith.constant 2.560000e+02 : f32
    %8 = vector.broadcast %cst_6 : f32 to vector<16x1xf32>
    %9 = arith.divf %7, %8 : vector<16x1xf32>
    %10 = vector.broadcast %9 : vector<16x1xf32> to vector<16x256xf32>
    %11 = arith.subf %5, %10 : vector<16x256xf32>
    %12 = arith.mulf %11, %11 : vector<16x256xf32>
    %cst_7 = arith.constant dense<0.000000e+00> : vector<16xf32>
    %13 = vector.multi_reduction <add>, %12, %cst_7 [1] : vector<16x256xf32> to vector<16xf32>
    %14 = vector.shape_cast %13 : vector<16xf32> to vector<16x1xf32>
    %cst_8 = arith.constant 2.560000e+02 : f32
    %15 = vector.broadcast %cst_8 : f32 to vector<16x1xf32>
    %16 = arith.divf %14, %15 : vector<16x1xf32>
    %cst_9 = arith.constant 9.99999974E-6 : f32
    %17 = vector.broadcast %cst_9 : f32 to vector<16x1xf32>
    %18 = arith.addf %16, %17 : vector<16x1xf32>
    %19 = math.rsqrt %18 : vector<16x1xf32>
    %20 = vector.broadcast %19 : vector<16x1xf32> to vector<16x256xf32>
    %21 = arith.mulf %11, %20 : vector<16x256xf32>
    %c0_10 = arith.constant 0 : index
    %c0_11 = arith.constant 0 : index
    %22 = vector.load %arg4[%c0_10, %c0_11] : memref<1x256xf32, #tpu.memory_space<vmem>>, vector<1x256xf32>
    %23 = vector.broadcast %22 : vector<1x256xf32> to vector<16x256xf32>
    %24 = arith.mulf %21, %23 : vector<16x256xf32>
    %c0_12 = arith.constant 0 : index
    %c0_13 = arith.constant 0 : index
    %25 = vector.load %arg5[%c0_12, %c0_13] : memref<1x256xf32, #tpu.memory_space<vmem>>, vector<1x256xf32>
    %26 = vector.broadcast %25 : vector<1x256xf32> to vector<16x256xf32>
    %27 = arith.addf %24, %26 : vector<16x256xf32>
    %28 = arith.truncf %27 : vector<16x256xf32> to vector<16x256xbf16>
    %c0_14 = arith.constant 0 : index
    %c0_15 = arith.constant 0 : index
    %29 = vector.load %arg6[%c0_14, %c0_15] : memref<16x256xbf16, #tpu.memory_space<vmem>>, vector<16x256xbf16>
    tpu.vector_store %arg6[%c0_14, %c0_15], %28 {strides = array<i32>} : memref<16x256xbf16, #tpu.memory_space<vmem>>, vector<16x256xbf16>,
    return
  }
  func.func @transform_0(%arg0: i32) -> (i32, i32) {
    %c0_i32 = arith.constant 0 : i32
    %c0_i32_0 = arith.constant 0 : i32
    return %arg0, %c0_i32 : i32, i32
  }
  func.func @transform_1(%arg0: i32) -> (i32, i32) {
    %c0_i32 = arith.constant 0 : i32
    %c0_i32_0 = arith.constant 0 : i32
    %c0_i32_1 = arith.constant 0 : i32
    return %c0_i32, %c0_i32_0 : i32, i32
  }
  func.func @transform_2(%arg0: i32) -> (i32, i32) {
    %c0_i32 = arith.constant 0 : i32
    %c0_i32_0 = arith.constant 0 : i32
    %c0_i32_1 = arith.constant 0 : i32
    return %c0_i32, %c0_i32_0 : i32, i32
  }
  func.func @transform_3(%arg0: i32) -> (i32, i32) {
    %c0_i32 = arith.constant 0 : i32
    %c0_i32_0 = arith.constant 0 : i32
    %c0_i32_1 = arith.constant 0 : i32
    return %c0_i32, %c0_i32_0 : i32, i32
  }
  func.func @transform_4(%arg0: i32) -> (i32, i32) {
    %c0_i32 = arith.constant 0 : i32
    %c0_i32_0 = arith.constant 0 : i32
    %c0_i32_1 = arith.constant 0 : i32
    return %c0_i32, %c0_i32_0 : i32, i32
  }
  func.func @transform_5(%arg0: i32) -> (i32, i32) {
    %c0_i32 = arith.constant 0 : i32
    %c0_i32_0 = arith.constant 0 : i32
    return %arg0, %c0_i32 : i32, i32
  }
}

</mosaic_0001>

<bundles_post_ra>
// kernel: overlap_patch_embed_forward.1
= control target key start
LH: loop header
LB: loop body
LE: loop exit
PB: predicated region body
PF: predicated region fallthrough
CT: control target
= control target key end

     0   :  { %10 = vsyncpa [#allocation3], 0  ;;  %s1276_s0 = inlined_call_operand.vmem [shape: bf16[32,256], index: 0, kind: input, shape index: {}]   ;;  %s1277_s1 = inlined_call_operand.vmem [shape: bf16[256,256], index: 1, kind: input, shape index: {}]   ;;  %s1278_s2 = inlined_call_operand.vmem [shape: f32[1,256], index: 2, kind: input, shape index: {}]   ;;  %s1279_s3 = inlined_call_operand.vmem [shape: f32[1,256], index: 3, kind: input, shape index: {}]   ;;  %s1280_s4 = inlined_call_operand.vmem [shape: f32[1,256], index: 4, kind: input, shape index: {}]   ;;  %s1281_s5 = inlined_call_operand.hbm [shape: bf16[32,256], index: 5, kind: output, shape index: {}]  }
   0x1   :  { %12 = vsyncpa [#allocation3 + $0x1], 0  ;;  %s987_s18 = smov 0   ;;  %s989_s19 = smov 0  }
   0x2   :  { %s991_s20 = smov 0   ;;  %s993_s21 = smov 0  }
   0x3 LB: > { %s1008_s22 = sadd.s32 4294967295, %s952_s21   ;;  %s655_s23 = sadd.s32 4294967294, %s952_s21   ;;  %s952_s21 = sphi %s993_s21, %s1287_s21   ;;  %s948_s20 = sphi %s991_s20, %s1286_s20   ;;  %s944_s19 = sphi %s989_s19, %s1285_s19   ;;  %s940_s18 = sphi %s987_s18, %s1284_s18  }
   0x4   : > { %s1012_s24 = sadd.s32 1, %s952_s21   ;;  %s135_s25 = sadd.s32 1, %s948_s20 }
   0x5   : > { %s132_s26 = ssub.s32 %s952_s21, %s1012_s24  ;;  %p145_p0 = scmp.ne.s32.totalorder %s948_s20, %s944_s19 }
   0x6   : > { %p133_p1 = scmp.eq.s32.totalorder %s132_s26, 0  ;;  %p146_p2 = scmp.eq.s32.totalorder %s1008_s22, 1 }
   0x7   : > { %p151_p3 = scmp.ne.s32.totalorder %s944_s19, %s940_s18  ;;  %p152_p4 = scmp.eq.s32.totalorder %s655_s23, 1 }
   0x8   : > { %s1023_s27 = scalar_select %p133_p1, %s948_s20, %s135_s25  }
   0x9   : > { %p1025_p5 = por %p146_p2, %p145_p0  ;;  %p1029_p6 = por %p152_p4, %p151_p3 }
   0xa   : > { %p658_p7 = scmp.ge.s32.totalorder %s952_s21, 1  ;;  %p192_p8 = scmp.lt.s32.totalorder %s952_s21, 3 }
   0xc   : > { %p193_p9 = pnand %p658_p7, %p192_p8 }
   0xd   : > { %s660_s17 = sshll.u32 (!%p193_p9), %s1008_s22, 1  ;;  %s218_s16 = sand.u32 (!%p193_p9), 1, %s944_s19  }
   0xe   : > { %196 = sbr.rel (%p193_p9) target bundleno = 474 (0x1da), region = 40  ;;  %p222_p10 = scmp.lt.s32.totalorder (!%p193_p9), %s660_s17, 3 }
   0xf   : > { %s659_s23 = sshll.u32 (!%p193_p9), %s218_s16, 4  ;;  %s841_s25 = sshll.u32 (!%p193_p9), %s1008_s22, 4 }
  0x10   : > { %s589_s6 = scalar_lea.hbm (!%p193_p9), %s1281_s5, %s841_s25  ;;  %s577_s22 = scalar_lea.sflag (!%p193_p9), [#allocation3], %s218_s16 }
  0x11   : > { %s592_s9 = sshll.u32 (!%p193_p9), %s589_s6, 4  ;;  %s910_s13 = scalar_lea.hbm (!%p193_p9), %s1281_s5, 32  ;;  %s593_s9 = int_to_ptr.hbm [resolvable:$true] %s592_s9 }
  0x13   : > { %v729_v0 = vld [vmem:[%s1277_s1 + $0x70] sm:$0xf]  ;;  %v823_v1 = vld [vmem:[%s1277_s1 + $0x74] sm:$0xf0]  ;;  %v822_v5 = vld [vmem:[%s1277_s1 + $0x74] sm:$0xf] }
  0x14   : > { %v793_v2 = vld [vmem:[%s1277_s1 + $0xf0] sm:$0xf]  ;;  %v730_v3 = vor.u32 %v823_v1, %v729_v0  ;;  %v839_v4 = vld [vmem:[%s1277_s1 + $0xf4] sm:$0xf0]  ;;  %v731_v6 = vld [vmem:[%s1277_s1 + $0x78] sm:$0xf0] }
  0x15   : > { %v794_v7 = vor.u32 %v839_v4, %v793_v2  ;;  %v734_v8 = vor.u32 %v822_v5, %v731_v6  ;;  %v838_v9 = vld [vmem:[%s1277_s1 + $0xf4] sm:$0xf]  ;;  %v795_v10 = vld [vmem:[%s1277_s1 + $0xf8] sm:$0xf0]  ;;  %v721_v11 = vld [vmem:[%s1277_s1 + $0x60] sm:$0xf] }
  0x16   : > { %439 = vmatpush.bf16.msra.mxu0 %v730_v3  ;;  %v798_v12 = vor.u32 %v838_v9, %v795_v10  ;;  %v821_v13 = vld [vmem:[%s1277_s1 + $0x64] sm:$0xf0]  ;;  %v785_v14 = vld [vmem:[%s1277_s1 + $0xe0] sm:$0xf]  ;;  %v820_v18 = vld [vmem:[%s1277_s1 + $0x64] sm:$0xf] }
  0x17   : > { %v837_v15 = vld [vmem:[%s1277_s1 + $0xe4] sm:$0xf0]  ;;  %453 = vmatpush.bf16.msra.mxu1 %v794_v7  ;;  %467 = vmatpush.bf16.msra.mxu2 %v734_v8  ;;  %v722_v16 = vor.u32 %v821_v13, %v721_v11  ;;  %v723_v19 = vld [vmem:[%s1277_s1 + $0x68] sm:$0xf0]  ;;  %v836_v20 = vld [vmem:[%s1277_s1 + $0xe4] sm:$0xf] }
  0x18   : > { %v786_v17 = vor.u32 %v837_v15, %v785_v14  ;;  %481 = vmatpush.bf16.msra.mxu3 %v798_v12  ;;  %v726_v21 = vor.u32 %v820_v18, %v723_v19  ;;  %v787_v22 = vld [vmem:[%s1277_s1 + $0xe8] sm:$0xf0]  ;;  %v713_v23 = vld [vmem:[%s1277_s1 + $0x50] sm:$0xf]  ;;  %v819_v24 = vld [vmem:[%s1277_s1 + $0x54] sm:$0xf0] }
  0x19   : > { %v790_v25 = vor.u32 %v836_v20, %v787_v22  ;;  %v777_v26 = vld [vmem:[%s1277_s1 + $0xd0] sm:$0xf]  ;;  %v835_v27 = vld [vmem:[%s1277_s1 + $0xd4] sm:$0xf0]  ;;  %v818_v28 = vld [vmem:[%s1277_s1 + $0x54] sm:$0xf]  ;;  %v714_v29 = vor.u32 %v819_v24, %v713_v23 }
  0x1a   : > { %440 = vmatpush.bf16.msra.mxu0 %v722_v16  ;;  %v715_v30 = vld [vmem:[%s1277_s1 + $0x58] sm:$0xf0]  ;;  %v834_v31 = vld [vmem:[%s1277_s1 + $0xd4] sm:$0xf]  ;;  %v778_v33 = vor.u32 %v835_v27, %v777_v26  ;;  %v705_v35 = vld [vmem:[%s1277_s1 + $0x40] sm:$0xf] }
  0x1b   : > { %v779_v32 = vld [vmem:[%s1277_s1 + $0xd8] sm:$0xf0]  ;;  %454 = vmatpush.bf16.msra.mxu1 %v786_v17  ;;  %468 = vmatpush.bf16.msra.mxu2 %v726_v21  ;;  %v718_v34 = vor.u32 %v818_v28, %v715_v30  ;;  %v817_v36 = vld [vmem:[%s1277_s1 + $0x44] sm:$0xf0]  ;;  %v769_v37 = vld [vmem:[%s1277_s1 + $0xc0] sm:$0xf] }
  0x1c   : > { %482 = vmatpush.bf16.msra.mxu3 %v790_v25  ;;  %v782_v38 = vor.u32 %v834_v31, %v779_v32  ;;  %v833_v39 = vld [vmem:[%s1277_s1 + $0xc4] sm:$0xf0]  ;;  %v816_v40 = vld [vmem:[%s1277_s1 + $0x44] sm:$0xf]  ;;  %v707_v41 = vld [vmem:[%s1277_s1 + $0x48] sm:$0xf0]  ;;  %v706_v44 = vor.u32 %v817_v36, %v705_v35 }
  0x1d   : > { %v832_v42 = vld [vmem:[%s1277_s1 + $0xc4] sm:$0xf]  ;;  %v771_v43 = vld [vmem:[%s1277_s1 + $0xc8] sm:$0xf0]  ;;  %v770_v45 = vor.u32 %v833_v39, %v769_v37  ;;  %v710_v46 = vor.u32 %v816_v40, %v707_v41  ;;  %v697_v47 = vld [vmem:[%s1277_s1 + $0x30] sm:$0xf] }
  0x1e   : > { %441 = vmatpush.bf16.msra.mxu0 %v714_v29  ;;  %v815_v48 = vld [vmem:[%s1277_s1 + $0x34] sm:$0xf0]  ;;  %v761_v49 = vld [vmem:[%s1277_s1 + $0xb0] sm:$0xf]  ;;  %v774_v50 = vor.u32 %v832_v42, %v771_v43  ;;  %v814_v52 = vld [vmem:[%s1277_s1 + $0x34] sm:$0xf] }
  0x1f   : > { %455 = vmatpush.bf16.msra.mxu1 %v778_v33  ;;  %469 = vmatpush.bf16.msra.mxu2 %v718_v34  ;;  %v831_v51 = vld [vmem:[%s1277_s1 + $0xb4] sm:$0xf0]  ;;  %v699_v53 = vld [vmem:[%s1277_s1 + $0x38] sm:$0xf0]  ;;  %v830_v54 = vld [vmem:[%s1277_s1 + $0xb4] sm:$0xf]  ;;  %v698_v56 = vor.u32 %v815_v48, %v697_v47 }
  0x20   : > { %483 = vmatpush.bf16.msra.mxu3 %v782_v38  ;;  %v763_v55 = vld [vmem:[%s1277_s1 + $0xb8] sm:$0xf0]  ;;  %v762_v57 = vor.u32 %v831_v51, %v761_v49  ;;  %v702_v58 = vor.u32 %v814_v52, %v699_v53  ;;  %v689_v59 = vld [vmem:[%s1277_s1 + $0x20] sm:$0xf]  ;;  %v813_v60 = vld [vmem:[%s1277_s1 + $0x24] sm:$0xf0] }
  0x21   : > { %v753_v61 = vld [vmem:[%s1277_s1 + $0xa0] sm:$0xf]  ;;  %v766_v62 = vor.u32 %v830_v54, %v763_v55  ;;  %v829_v63 = vld [vmem:[%s1277_s1 + $0xa4] sm:$0xf0]  ;;  %v812_v0 = vld [vmem:[%s1277_s1 + $0x24] sm:$0xf]  ;;  %v690_v4 = vor.u32 %v813_v60, %v689_v59 }
  0x22   : > { %442 = vmatpush.bf16.msra.mxu0 %v706_v44  ;;  %v691_v1 = vld [vmem:[%s1277_s1 + $0x28] sm:$0xf0]  ;;  %v828_v2 = vld [vmem:[%s1277_s1 + $0xa4] sm:$0xf]  ;;  %v681_v5 = vld [vmem:[%s1277_s1 + $0x10] sm:$0xf]  ;;  %v754_v6 = vor.u32 %v829_v63, %v753_v61 }
  0x23   : > { %456 = vmatpush.bf16.msra.mxu1 %v770_v45  ;;  %470 = vmatpush.bf16.msra.mxu2 %v710_v46  ;;  %v755_v3 = vld [vmem:[%s1277_s1 + $0xa8] sm:$0xf0]  ;;  %v694_v7 = vor.u32 %v812_v0, %v691_v1  ;;  %v811_v8 = vld [vmem:[%s1277_s1 + $0x14] sm:$0xf0]  ;;  %v745_v9 = vld [vmem:[%s1277_s1 + $0x90] sm:$0xf] }
  0x24   : > { %484 = vmatpush.bf16.msra.mxu3 %v774_v50  ;;  %v827_v10 = vld [vmem:[%s1277_s1 + $0x94] sm:$0xf0]  ;;  %v758_v11 = vor.u32 %v828_v2, %v755_v3  ;;  %v810_v12 = vld [vmem:[%s1277_s1 + $0x14] sm:$0xf]  ;;  %v683_v13 = vld [vmem:[%s1277_s1 + $0x18] sm:$0xf0]  ;;  %v682_v16 = vor.u32 %v811_v8, %v681_v5 }
  0x25   : > { %v826_v14 = vld [vmem:[%s1277_s1 + $0x94] sm:$0xf]  ;;  %v747_v15 = vld [vmem:[%s1277_s1 + $0x98] sm:$0xf0]  ;;  %v673_v17 = vld [vmem:[%s1277_s1] sm:$0xf]  ;;  %v746_v18 = vor.u32 %v827_v10, %v745_v9  ;;  %v686_v19 = vor.u32 %v810_v12, %v683_v13 }
  0x26   : > { %443 = vmatpush.bf16.msra.mxu0 %v698_v56  ;;  %v809_v20 = vld [vmem:[%s1277_s1 + $0x4] sm:$0xf0]  ;;  %v737_v21 = vld [vmem:[%s1277_s1 + $0x80] sm:$0xf]  ;;  %s1289_s17 = smov (!%p222_p10, %s660_s17), 3  ;;  %v750_v22 = vor.u32 %v826_v14, %v747_v15  ;;  %v954_v59 = vmov 256.0  }
  0x27   : > { %457 = vmatpush.bf16.msra.mxu1 %v762_v57  ;;  %471 = vmatpush.bf16.msra.mxu2 %v702_v58  ;;  %v825_v23 = vld [vmem:[%s1277_s1 + $0x84] sm:$0xf0]  ;;  %v808_v24 = vld [vmem:[%s1277_s1 + $0x4] sm:$0xf]  ;;  %v675_v25 = vld [vmem:[%s1277_s1 + $0x8] sm:$0xf0]  ;;  %v674_v28 = vor.u32 %v809_v20, %v673_v17  ;;  %884 = vrcp.f32 %v954_v59 }
  0x28   : > { %485 = vmatpush.bf16.msra.mxu3 %v766_v62  ;;  %v824_v26 = vld [vmem:[%s1277_s1 + $0x84] sm:$0xf]  ;;  %v739_v27 = vld [vmem:[%s1277_s1 + $0x88] sm:$0xf0]  ;;  %s805_s7 = sshll.u32 %s1289_s17, 3  ;;  %v738_v29 = vor.u32 %v825_v23, %v737_v21  ;;  %v678_v30 = vor.u32 %v808_v24, %v675_v25 }
  0x29   : > { %s226_s10 = scalar_lea.vmem %s1276_s0, %s805_s7  ;;  %v742_v34 = vor.u32 %v824_v26, %v739_v27  ;;  %v263_v38 = vld [vmem:[%s1278_s2] sm:$0x3]  ;;  %s220_s7 = scalar_lea.vmem [#allocation2], %s659_s23 }
  0x2a   : > { %444 = vmatpush.bf16.msra.mxu0 %v690_v4  ;;  %v665_v31 = vld [vmem:[%s226_s10] sm:$0xf]  ;;  %v807_v32 = vld [vmem:[%s226_s10 + $0x4] sm:$0xf0]  ;;  %v806_v33 = vld [vmem:[%s226_s10 + $0x4] sm:$0xf] }
  0x2b   : > { %458 = vmatpush.bf16.msra.mxu1 %v754_v6  ;;  %472 = vmatpush.bf16.msra.mxu2 %v694_v7  ;;  %v667_v35 = vld [vmem:[%s226_s10 + $0x8] sm:$0xf0]  ;;  %v666_v36 = vor.u32 %v807_v32, %v665_v31  ;;  %v265_v39 = vperm.slane %v263_v38, 0  ;;  %v266_v42 = vperm.slane %v263_v38, 1  ;;  %v552_v26 = vld [vmem:[%s1279_s3] sm:$0x3] }
  0x2c   : > { %486 = vmatpush.bf16.msra.mxu3 %v758_v11  ;;  %v670_v37 = vor.u32 %v806_v33, %v667_v35  ;;  %v554_v32 = vperm.slane %v552_v26, 0  ;;  %v555_v33 = vperm.slane %v552_v26, 1  ;;  %s590_s8 = sshll.u32 %s220_s7, 4  ;;  %s904_s10 = sshra.s32 %s593_s9, 4  ;;  %s591_s8 = int_to_ptr.vmem [resolvable:$true] %s590_s8  ;;  %s905_s10 = int_to_ptr.hbm [resolvable:$true] %s904_s10 }
  0x2d   : > { %v885_v60 = vpop.eup %884  ;;  %s906_s17 = scalar_lea.hbm %s905_s10, 16  ;;  %p911_p0 = scmp.lt.s32.totalorder %s905_s10, %s1281_s5 }
  0x2e   : > { %445 = vmatpush.bf16.msra.mxu0 %v682_v16  ;;  %v502_v61 = vmul.f32 256.0, %v885_v60  ;;  %vm506_vm0 = vweird.f32 %v885_v60  ;;  %p907_p11 = scmp.ne.s32.totalorder %s905_s10, %s906_s17  ;;  %p912_p1 = scmp.lt.s32.totalorder %s910_s13, %s906_s17 }
  0x2f   : > { %459 = vmatpush.bf16.msra.mxu1 %v746_v18  ;;  %473 = vmatpush.bf16.msra.mxu2 %v686_v19 }
  0x30   : > { %487 = vmatpush.bf16.msra.mxu3 %v750_v22  ;;  %v503_v62 = vsub.f32 1.0, %v502_v61  ;;  %p908_p12 = pnand %p907_p11, %p1025_p5  ;;  %p913_p2 = por %p912_p1, %p911_p0 }
  0x32   : > { %446 = vmatpush.bf16.msra.mxu0 %v674_v28  ;;  %v504_v63 = vmul.f32 %v885_v60, %v503_v62  ;;  %p909_p13 = pneg %p908_p12 }
  0x33   : > { %460 = vmatpush.bf16.msra.mxu1 %v738_v29  ;;  %474 = vmatpush.bf16.msra.mxu2 %v678_v30  ;;  %v562_v29 = vld [vmem:[%s1280_s4] sm:$0x3] }
  0x34   : > { %488 = vmatpush.bf16.msra.mxu3 %v742_v34  ;;  %v505_v0 = vadd.f32 %v885_v60, %v504_v63  ;;  %p914_p3 = pnand %p913_p2, %p909_p13 }
  0x35   : > { %447 = vmatmul.bf16.vlgmr.msra.gmra.mxu0 %v666_v36 }
  0x36   : > { %461 = vmatmul.bf16.vlgmr.msra.gmra.mxu1 %v670_v37  ;;  %475 = vmatmul.bf16.vlgmr.msra.gmra.mxu2 %v666_v36  ;;  %v507_v1 = vsel %vm506_vm0, %v885_v60, %v505_v0  ;;  %v564_v36 = vperm.slane %v562_v29, 0 }
  0x37   : > { %489 = vmatmul.bf16.vlgmr.msra.gmra.mxu3 %v670_v37  ;;  %v565_v37 = vperm.slane %v562_v29, 1 }
  0xb2   : > { %v448_v40 = vpop.f32.mrf.mxu0 }
  0xb3   : > { %v449_v41 = vadd.f32 %v448_v40, %v265_v39  ;;  %v462_v43 = vpop.f32.mrf.mxu1 }
  0xb5   : > { %v463_v45 = vadd.f32 %v462_v43, %v449_v41 }
  0xb9   : > { %v476_v44 = vpop.f32.mrf.mxu2 }
  0xba   : > { %v477_v46 = vadd.f32 %v476_v44, %v266_v42  ;;  %v490_v47 = vpop.f32.mrf.mxu3  ;;  %v450_v49 = vpop.f32.mrf.mxu0 }
  0xbb   : > { %v451_v51 = vadd.f32 %v450_v49, %v265_v39  ;;  %v464_v54 = vpop.f32.mrf.mxu1 }
  0xbc   : > { %v491_v48 = vadd.f32 %v490_v47, %v477_v46 }
  0xbd   : > { %v465_v56 = vadd.f32 %v464_v54, %v451_v51 }
  0xbe   : > { %v495_v50 = vadd.f32 %v491_v48, %v463_v45 }
  0xc0   : > { %496 = vadd.xlane.f32.xlu0 %v495_v50 }
  0xc1   : > { %v478_v52 = vpop.f32.mrf.mxu2 }
  0xc2   : > { %v479_v53 = vadd.f32 %v478_v52, %v266_v42  ;;  %v492_v55 = vpop.f32.mrf.mxu3 }
  0xc4   : > { %v493_v57 = vadd.f32 %v492_v55, %v479_v53 }
  0xc6   : > { %v498_v58 = vadd.f32 %v493_v57, %v465_v56 }
  0xc8   : > { %499 = vadd.xlane.f32.xlu0 %v498_v58 }
 0x133   : > { %v497_v2 = vpop.xlane.xlu0 %496 }
 0x134   : > { %v508_v3 = vmul.f32 %v507_v1, %v497_v2 }
 0x136   : > { %v510_v4 = vsub.f32 %v463_v45, %v508_v3  ;;  %v511_v5 = vsub.f32 %v491_v48, %v508_v3 }
 0x138   : > { %v514_v6 = vmul.f32 %v510_v4, %v510_v4  ;;  %v515_v7 = vmul.f32 %v511_v5, %v511_v5 }
 0x13a   : > { %v518_v8 = vadd.f32 %v515_v7, %v514_v6 }
 0x13b   : > { %v500_v9 = vpop.xlane.xlu0 %499 }
 0x13c   : > { %v509_v10 = vmul.f32 %v507_v1, %v500_v9  ;;  %519 = vadd.xlane.f32.xlu1 %v518_v8 }
 0x13e   : > { %v512_v11 = vsub.f32 %v465_v56, %v509_v10  ;;  %v513_v12 = vsub.f32 %v493_v57, %v509_v10 }
 0x140   : > { %v516_v13 = vmul.f32 %v512_v11, %v512_v11  ;;  %v517_v14 = vmul.f32 %v513_v12, %v513_v12 }
 0x142   : > { %v521_v15 = vadd.f32 %v517_v14, %v516_v13 }
 0x144   : > { %522 = vadd.xlane.f32.xlu1 %v521_v15 }
 0x1af   : > { %v520_v16 = vpop.xlane.xlu1 %519 }
 0x1b0   : > { %v524_v17 = vmul.f32 %v520_v16, %v507_v1 }
 0x1b2   : > { %v526_v18 = vadd.f32 1e-05, %v524_v17 }
 0x1b4   : > { %886 = vrsqrt.f32 %v526_v18  ;;  %vm534_vm2 = vweird.f32 %v526_v18 }
 0x1b7   : > { %v523_v19 = vpop.xlane.xlu1 %522 }
 0x1b8   : > { %v525_v20 = vmul.f32 %v523_v19, %v507_v1 }
 0x1ba   : > { %v887_v21 = vpop.eup %886  ;;  %v527_v22 = vadd.f32 1e-05, %v525_v20 }
 0x1bb   : > { %v529_v23 = vmul.f32 %v887_v21, %v526_v18  ;;  %vm535_vm1 = vweird.f32 %v887_v21 }
 0x1bc   : > { %888 = vrsqrt.f32 %v527_v22  ;;  %vm536_vm3 = vmor %vm534_vm2, %vm535_vm1  ;;  %vm544_vm5 = vweird.f32 %v527_v22 }
 0x1bd   : > { %v530_v24 = vmul.f32 %v887_v21, %v529_v23 }
 0x1bf   : > { %v531_v25 = vmul.f32 0.5, %v530_v24 }
 0x1c1   : > { %v532_v27 = vsub.f32 1.5, %v531_v25 }
 0x1c2   : > { %v889_v28 = vpop.eup %888 }
 0x1c3   : > { %v533_v30 = vmul.f32 %v887_v21, %v532_v27  ;;  %v539_v31 = vmul.f32 %v889_v28, %v527_v22  ;;  %vm545_vm4 = vweird.f32 %v889_v28 }
 0x1c4   : > { %vm546_vm6 = vmor %vm544_vm5, %vm545_vm4 }
 0x1c5   : > { %v537_v34 = vsel %vm536_vm3, %v887_v21, %v533_v30  ;;  %v540_v35 = vmul.f32 %v889_v28, %v539_v31 }
 0x1c6   : > { %v548_v38 = vmul.f32 %v537_v34, %v510_v4  ;;  %v549_v39 = vmul.f32 %v537_v34, %v511_v5 }
 0x1c7   : > { %v541_v40 = vmul.f32 0.5, %v540_v35 }
 0x1c8   : > { %v558_v41 = vmul.f32 %v554_v32, %v548_v38  ;;  %v559_v42 = vmul.f32 %v555_v33, %v549_v39 }
 0x1c9   : > { %v542_v43 = vsub.f32 1.5, %v541_v40 }
 0x1ca   : > { %v568_v44 = vadd.f32 %v564_v36, %v558_v41  ;;  %v569_v45 = vadd.f32 %v565_v37, %v559_v42 }
 0x1cb   : > { %v543_v46 = vmul.f32 %v889_v28, %v542_v43 }
 0x1cc   : > { %v572_v47 = vpack.c.bf16 %v569_v45, %v568_v44 }
 0x1cd   : > { %v547_v48 = vsel %vm546_vm6, %v889_v28, %v543_v46 }
 0x1ce   : > { %v550_v49 = vmul.f32 %v547_v48, %v512_v11  ;;  %v551_v50 = vmul.f32 %v547_v48, %v513_v12  ;;  %574 = vst [vmem:[%s220_s7] sm:$0xff] %v572_v47 }
 0x1d0   : > { %v560_v51 = vmul.f32 %v554_v32, %v550_v49  ;;  %v561_v52 = vmul.f32 %v555_v33, %v551_v50 }
 0x1d2   : > { %v570_v53 = vadd.f32 %v564_v36, %v560_v51  ;;  %v571_v54 = vadd.f32 %v565_v37, %v561_v52 }
 0x1d4   : > { %v573_v55 = vpack.c.bf16 %v571_v54, %v570_v53 }
 0x1d6   : > { %575 = vst [vmem:[%s220_s7 + $0x8] sm:$0xff] %v573_v55 }
 0x1d7   : > { %917 = shalt.err (!%p914_p3)
}
 0x1d8   : > { %s955_s16 = smov 128   ;;  %s956_s23 = smov 8  }
 0x1d9   : > { %842 = dma.vmem_to_hbm [thread:$0]  (%p1025_p5), %s591_s8, 256, %s593_s9, %s577_s22, %s955_s16, %s955_s16, %s956_s23  }
 0x1da PF: > { %p848_p4 = scmp.ge.s32.totalorder %s952_s21, 2  ;;  %s607_s25 = sand.u32 1, %s940_s18  }
 0x1db   : > { %s608_s26 = scalar_lea.sflag [#allocation3], %s607_s25 }
 0x1dc   : > { %p845_p7 = pnand %p848_p4, %p1029_p6 }
 0x1de   : > { %p846_p8 = pneg %p845_p7 }
 0x1e0   : > { %935 = dma.done.wait (%p846_p8), %s608_s26, 256  }
 0x1e1   : > { %937 = vsyncadd (%p846_p8), %s608_s26, 4294967040  ;;  %p15_p9 = scmp.ge.s32.totalorder %s1012_s24, 4   ;;  %s1284_s18 = smov %s944_s19 }
 0x1e2   : > { %s1285_s19 = smov %s948_s20  ;;  %s1286_s20 = smov %s1023_s27 }
 0x1e3   : > { %s1287_s21 = smov %s1012_s24  ;;  %17 = sbr.rel (!%p15_p9) target bundleno = 3 (0x3), region = 75 }
 0x1e8   :  { %614 = vsyncpa [#allocation3], 1 }
 0x1e9   :  { %616 = vsyncpa [#allocation3 + $0x1], 1 }

</bundles_post_ra>
